<compile_context>
chip_gen: v7x
topology: tpu7x:2x2x1
jax: 0.10.0
libtpu: 0.0.40
codegen_flags: <defaults>
</compile_context>

<pallas_src>
import numpy as np
import jax
import jax.numpy as jnp
from jax import lax
from jax.experimental import pallas as pl
from jax.experimental.pallas import tpu as pltpu


def _round_up(x, m):
    return (x + m - 1) // m * m


# -----------------------------------------------------------------------------
# Fused lookup table (built ONCE, outside the per-call path).
# Row layout:
#   [0, V)            token embedding rows          (nn.Embedding aa_dict_size)
#   [V, V+ML)         parent-index embedding rows   (nn.Embedding max_len)
#   [V+ML, V+ML+P)    sinusoidal PE rows for integer positions 0..P-1,
#                     computed in float64 (matches PyTorch's float64 div_term)
#   [V+ML+P, NC_pad)  all-zero rows; row NC is the "no parent PE" row
# Columns are zero-padded H -> H_pad = round_up(H, 128) for lane-dense stores.
# -----------------------------------------------------------------------------
def build_fused_table(tok_table, idx_table, hidden_size, max_pos,
                      lambda_max=10000.0, lambda_min=1e-5,
                      table_dtype=jnp.float32):
    H = int(hidden_size)
    assert H % 2 == 0, "hidden_size must be even for sin/cos positional encoding"
    V = int(tok_table.shape[0])      # aa_dict_size
    ML = int(idx_table.shape[0])     # max_len
    P = int(max(int(max_pos), ML))   # PE rows must cover pos_index and parent ids

    base = lambda_max / (2.0 * np.pi)
    scale = lambda_min / lambda_max
    div = base * scale ** (np.arange(0, H, 2, dtype=np.float64) / H)      # (H/2,)
    pos = np.arange(P, dtype=np.float64)[:, None]
    pe = np.concatenate([np.sin(pos / div), np.cos(pos / div)], axis=1)   # (P, H)

    NC = V + ML + P
    NC_pad = _round_up(NC + 1, 128)   # +1 guarantees at least one spare zero row
    H_pad = _round_up(H, 128)

    table = np.zeros((NC_pad, H_pad), dtype=np.float32)
    table[:V, :H] = np.asarray(tok_table, dtype=np.float32)
    table[V:V + ML, :H] = np.asarray(idx_table, dtype=np.float32)
    table[V + ML:NC, :H] = pe.astype(np.float32)

    dims = dict(V=V, ML=ML, P=P, NC=NC, NC_pad=NC_pad, H=H, H_pad=H_pad)
    return jnp.asarray(table, dtype=table_dtype), dims


def _embedding_kernel(meta_ref, tab_ref, out_ref):
    """One multi-hot (R, NC_pad) x (NC_pad, H_pad) matmul on the MXU.

    meta_ref: (blk, 3) int32  [emb column, pos-PE column, parent-PE column]
    tab_ref : (NC_pad, H_pad) fused embedding + PE table
    out_ref : (blk, H_pad) float32
    """
    blk = out_ref.shape[0]
    nc = tab_ref.shape[0]
    lane = lax.broadcasted_iota(jnp.int32, (blk, nc), 1)
    # Multi-hot row = onehot(emb col) + onehot(pos-PE col) + onehot(parent-PE col);
    # non-mono rows point their parent-PE column at an all-zero table row.
    mh = ((meta_ref[:, 0:1] == lane).astype(tab_ref.dtype)
          + (meta_ref[:, 1:2] == lane).astype(tab_ref.dtype)
          + (meta_ref[:, 2:3] == lane).astype(tab_ref.dtype))
    out_ref[...] = jnp.dot(
        mh, tab_ref[...],
        preferred_element_type=jnp.float32,
        precision=lax.Precision.HIGHEST,
    ).astype(out_ref.dtype)


def glycan_seq_index_first_embedding(tgt, pos_index, fused_table, dims,
                                     block_rows=1024):
    B, L = tgt.shape
    V, ML, NC = dims["V"], dims["ML"], dims["NC"]
    NC_pad, H, H_pad = dims["NC_pad"], dims["H"], dims["H_pad"]
    pe_base = V + ML
    zero_col = NC                                   # guaranteed all-zero table row

    tgt = tgt.astype(jnp.int32)
    pos_index = pos_index.astype(jnp.int32)

    # Per-slot parity (tiny O(L) wrapper-side arrays).
    l_idx = jnp.arange(L, dtype=jnp.int32)
    is_odd = (l_idx % 2) == 1                                 # parent-index slots
    is_mono = jnp.logical_and((l_idx % 2) == 0, l_idx >= 2)   # monosaccharide slots

    col = tgt + is_odd[None, :].astype(jnp.int32) * V                      # emb row
    pos_col = pe_base + pos_index                                          # PE(pos)
    prev = jnp.concatenate([jnp.zeros((B, 1), jnp.int32), tgt[:, :-1]], axis=1)
    prev_col = jnp.where(is_mono[None, :], pe_base + prev, zero_col)       # PE(parent)

    rows = B * L
    meta = jnp.stack([col, pos_col, prev_col], axis=-1).reshape(rows, 3)

    # Row blocking: big blocks amortize the ~0.35us/step pipeline overhead, but
    # keep >=2 grid steps so v7x's two TensorCores both get work.
    blk = min(block_rows, _round_up(rows, 8))
    if _round_up(rows, blk) // blk < 2 and rows > 8:
        blk = _round_up((rows + 1) // 2, 8)
    padded = _round_up(rows, blk)
    # TODO(synk): padded rows (rows..padded) gather table row 0 and are sliced
    # away; wasted output bandwidth is bounded by one row block.
    meta = jnp.pad(meta, ((0, padded - rows), (0, 0)))

    tab_itemsize = jnp.dtype(fused_table.dtype).itemsize
    vmem_need = (2 * blk * H_pad * 4                    # output double buffer
                 + 2 * blk * 128 * 4                    # meta double buffer (lane-padded)
                 + 2 * NC_pad * H_pad * tab_itemsize    # table buffers
                 + blk * NC_pad * tab_itemsize          # multi-hot temp
                 + 2 * blk * H_pad * 4)                 # matmul result + headroom
    vmem_limit = int(min(max(2 * vmem_need, 32 << 20), 64 << 20))

    grid_spec = pltpu.PrefetchScalarGridSpec(
        num_scalar_prefetch=0,
        grid=(padded // blk,),
        in_specs=[
            pl.BlockSpec((blk, 3), lambda r: (r, 0)),        # fused per-row metadata
            # Constant index_map -> fetched once across the grid; table is small.
            pl.BlockSpec((NC_pad, H_pad), lambda r: (0, 0)),
        ],
        out_specs=pl.BlockSpec((blk, H_pad), lambda r: (r, 0)),
    )

    out = pl.pallas_call(
        _embedding_kernel,
        out_shape=jax.ShapeDtypeStruct((padded, H_pad), jnp.float32),
        grid_spec=grid_spec,
        compiler_params=pltpu.CompilerParams(
            dimension_semantics=("parallel",),
            vmem_limit_bytes=vmem_limit),
    )(meta, fused_table)

    return out[:rows, :H].reshape(B, L, H)


# ------------------------- float64 numpy reference --------------------------
def _reference_numpy(tgt, pos_index, tok_table, idx_table, hidden,
                     lambda_max=10000.0, lambda_min=1e-5):
    tgt = np.asarray(tgt)
    pos = np.asarray(pos_index)
    tok = np.asarray(tok_table, dtype=np.float64)
    idx = np.asarray(idx_table, dtype=np.float64)
    B, L = tgt.shape
    base = lambda_max / (2.0 * np.pi)
    scale = lambda_min / lambda_max
    div = base * scale ** (np.arange(0, hidden, 2, dtype=np.float64) / hidden)

    def pe(x):
        x = np.asarray(x, dtype=np.float64)[..., None]
        return np.concatenate([np.sin(x / div), np.cos(x / div)], axis=-1)

    out = np.zeros((B, L, hidden), dtype=np.float64)
    out[:, 0] = tok[tgt[:, 0]]
    out[:, 1::2] = idx[tgt[:, 1::2]]
    n_mono = out[:, 2::2].shape[1]
    out[:, 2::2] = tok[tgt[:, 2::2]] + pe(tgt[:, 1::2])[:, :n_mono]
    out = out + pe(pos)
    return out.astype(np.float32)


if __name__ == "__main__":
    key = jax.random.PRNGKey(0)
    k_tok, k_idx = jax.random.split(key)

    # Small shapes consistent with the module: hidden=32, aa_dict_size=12, max_len=16.
    H = 32
    aa_dict_size, max_len = 12, 16
    tok_table = jax.random.normal(k_tok, (aa_dict_size, H), dtype=jnp.float32)
    idx_table = jax.random.normal(k_idx, (max_len, H), dtype=jnp.float32)

    # Fused embedding + PE table built once (parameter-init time, not per call).
    fused_table, dims = build_fused_table(tok_table, idx_table, H, max_pos=16)

    # Check both odd and even sequence lengths (the PyTorch module branches on it).
    for B, L in [(2, 9), (2, 10)]:
        ke, ko = jax.random.split(jax.random.fold_in(key, L))
        even_ids = jax.random.randint(ke, (B, L), 0, aa_dict_size)
        odd_ids = jax.random.randint(ko, (B, L), 0, max_len)
        seq_pos = jnp.arange(L, dtype=jnp.int32)
        tgt = jnp.where((seq_pos % 2) == 1, odd_ids, even_ids).astype(jnp.int32)
        pos_index = jnp.broadcast_to(seq_pos[None, :], (B, L)).astype(jnp.int32)

        out = glycan_seq_index_first_embedding(tgt, pos_index, fused_table, dims)
        out = jax.block_until_ready(out)

        assert out.shape == (B, L, H)
        assert out.dtype == jnp.float32
        ref = _reference_numpy(tgt, pos_index, tok_table, idx_table, H)
        np.testing.assert_allclose(np.asarray(out), ref, rtol=1e-3, atol=1e-3)

    print("KERNEL_OK")
</pallas_src>

<mosaic_0001>
module attributes {stable_mosaic.version = 11 : i64} {
  func.func @_embedding_kernel(%arg0: i32, %arg1: memref<16x3xi32, #tpu.memory_space<vmem>>, %arg2: memref<128x128xf32, #tpu.memory_space<vmem>>, %arg3: memref<16x128xf32, #tpu.memory_space<vmem>>) attributes {dimension_semantics = [#tpu.dimension_semantics<parallel>], iteration_bounds = array<i64: 2>, scalar_prefetch = 0 : i64, scratch_operands = 0 : i64, tpu.core_type = #tpu.core_type<tc>, window_params = [{transform_indices = @transform_0, window_bounds = array<i64: 16, 3>}, {pipeline_mode = #tpu.pipeline_mode<synchronous>, transform_indices = @transform_1, window_bounds = array<i64: 128, 128>}, {transform_indices = @transform_2, window_bounds = array<i64: 16, 128>}]} {
    %0 = tpu.iota {dimensions = array<i32: 1>} : vector<16x128xi32>
    %c0 = arith.constant 0 : index
    %c0_0 = arith.constant 0 : index
    %1 = vector.load %arg1[%c0, %c0_0] : memref<16x3xi32, #tpu.memory_space<vmem>>, vector<16x1xi32>
    %2 = vector.broadcast %1 : vector<16x1xi32> to vector<16x128xi32>
    %3 = arith.cmpi eq, %2, %0 : vector<16x128xi32>
    %4 = arith.extui %3 : vector<16x128xi1> to vector<16x128xi32>
    %5 = arith.sitofp %4 : vector<16x128xi32> to vector<16x128xf32>
    %c0_1 = arith.constant 0 : index
    %c1 = arith.constant 1 : index
    %6 = vector.load %arg1[%c0_1, %c1] : memref<16x3xi32, #tpu.memory_space<vmem>>, vector<16x1xi32>
    %7 = vector.broadcast %6 : vector<16x1xi32> to vector<16x128xi32>
    %8 = arith.cmpi eq, %7, %0 : vector<16x128xi32>
    %9 = arith.extui %8 : vector<16x128xi1> to vector<16x128xi32>
    %10 = arith.sitofp %9 : vector<16x128xi32> to vector<16x128xf32>
    %11 = arith.addf %5, %10 : vector<16x128xf32>
    %c0_2 = arith.constant 0 : index
    %c2 = arith.constant 2 : index
    %12 = vector.load %arg1[%c0_2, %c2] : memref<16x3xi32, #tpu.memory_space<vmem>>, vector<16x1xi32>
    %13 = vector.broadcast %12 : vector<16x1xi32> to vector<16x128xi32>
    %14 = arith.cmpi eq, %13, %0 : vector<16x128xi32>
    %15 = arith.extui %14 : vector<16x128xi1> to vector<16x128xi32>
    %16 = arith.sitofp %15 : vector<16x128xi32> to vector<16x128xf32>
    %17 = arith.addf %11, %16 : vector<16x128xf32>
    %c0_3 = arith.constant 0 : index
    %c0_4 = arith.constant 0 : index
    %18 = vector.load %arg2[%c0_3, %c0_4] : memref<128x128xf32, #tpu.memory_space<vmem>>, vector<128x128xf32>
    %cst = arith.constant dense<0.000000e+00> : vector<16x128xf32>
    %19 = tpu.matmul %17, %18, %cst {dimension_numbers = #tpu.dot_dimension_numbers<[1], [0], [0], [1], [0, 0, 1, 1], [], []>, precision = #tpu.contract_precision<fp32>} : vector<16x128xf32>, vector<128x128xf32>, vector<16x128xf32> -> vector<16x128xf32>
    %c0_5 = arith.constant 0 : index
    %c0_6 = arith.constant 0 : index
    %20 = vector.load %arg3[%c0_5, %c0_6] : memref<16x128xf32, #tpu.memory_space<vmem>>, vector<16x128xf32>
    tpu.vector_store %arg3[%c0_5, %c0_6], %19 {strides = array<i32>} : memref<16x128xf32, #tpu.memory_space<vmem>>, vector<16x128xf32>,
    return
  }
  func.func @transform_0(%arg0: i32) -> (i32, i32) {
    %c0_i32 = arith.constant 0 : i32
    %c0_i32_0 = arith.constant 0 : i32
    return %arg0, %c0_i32 : i32, i32
  }
  func.func @transform_1(%arg0: i32) -> (i32, i32) {
    %c0_i32 = arith.constant 0 : i32
    %c0_i32_0 = arith.constant 0 : i32
    %c0_i32_1 = arith.constant 0 : i32
    return %c0_i32, %c0_i32_0 : i32, i32
  }
  func.func @transform_2(%arg0: i32) -> (i32, i32) {
    %c0_i32 = arith.constant 0 : i32
    %c0_i32_0 = arith.constant 0 : i32
    return %arg0, %c0_i32 : i32, i32
  }
}

</mosaic_0001>

<bundles_post_ra>
// kernel: tpu_custom_call.1
= control target key start
LH: loop header
LB: loop body
LE: loop exit
PB: predicated region body
PF: predicated region fallthrough
CT: control target
= control target key end

     0   :  { %7 = vsyncpa [#allocation3], 0  ;;  %s2168_s0 = inlined_call_operand.vmem [shape: s32[32,3], index: 0, kind: input, shape index: {}]   ;;  %s2169_s1 = inlined_call_operand.hbm [shape: f32[128,128], index: 1, kind: input, shape index: {}]   ;;  %s2170_s2 = inlined_call_operand.hbm [shape: f32[32,128], index: 2, kind: output, shape index: {}]  }
   0x1   :  { %8 = vsyncpa [#allocation4], 0 }
   0x2   :  { %10 = vsyncpa [#allocation4 + $0x1], 0  ;;  %s1720_s9 = smov 0   ;;  %s1722_s10 = smov 0  }
   0x3   :  { %s1724_s11 = smov 0   ;;  %s1726_s12 = smov 0  }
   0x4 LB: > { %s1741_s13 = sadd.s32 4294967295, %s1693_s12   ;;  %s994_s14 = sadd.s32 4294967294, %s1693_s12   ;;  %s1693_s12 = sphi %s1726_s12, %s2186_s12   ;;  %s1689_s11 = sphi %s1724_s11, %s2185_s11   ;;  %s1685_s10 = sphi %s1722_s10, %s2184_s10   ;;  %s1681_s9 = sphi %s1720_s9, %s2183_s9  }
   0x5   : > { %s1745_s15 = sadd.s32 1, %s1693_s12   ;;  %s70_s16 = sadd.s32 1, %s1689_s11 }
   0x6   : > { %s67_s17 = ssub.s32 %s1693_s12, %s1745_s15  ;;  %p80_p0 = scmp.ne.s32.totalorder %s1689_s11, %s1685_s10 }
   0x7   : > { %p68_p1 = scmp.eq.s32.totalorder %s67_s17, 0  ;;  %p81_p2 = scmp.eq.s32.totalorder %s1741_s13, 1 }
   0x8   : > { %p86_p3 = scmp.ne.s32.totalorder %s1685_s10, %s1681_s9  ;;  %p87_p4 = scmp.eq.s32.totalorder %s994_s14, 1 }
   0x9   : > { %s1756_s18 = scalar_select %p68_p1, %s1689_s11, %s70_s16  }
   0xa   : > { %p1758_p5 = por %p81_p2, %p80_p0  ;;  %p1762_p6 = por %p87_p4, %p86_p3 }
   0xb   : > { %p995_p7 = scmp.ge.s32.totalorder %s1693_s12, 1  ;;  %p94_p8 = scmp.lt.s32.totalorder %s1693_s12, 3 }
   0xc   : > { %s2174_s19 = scalar_select %p1758_p5, 1, 0 }
   0xd   : > { %s2175_s20 = scalar_select %p1762_p6, 1, 0 }
   0xe   : > { %p2171_p9 = scmp.eq.s32.totalorder %s1741_s13, 0  ;;  %p1769_p10 = pnand %p995_p7, %p94_p8 }
   0xf   : > { %s1695_s22 = smov [#allocation2]   ;;  %s1599_s27 = scalar_lea.hbm %s2169_s1, 2048 }
  0x10   : > { %s2176_s21 = scalar_select %p1769_p10, 1, 0 }
  0x11   : > { %s106_s23 = sshll.u32 %s1695_s22, 4  ;;  %p1541_p11 = pneg %p1769_p10  ;;  %s107_s23 = int_to_ptr.vmem [resolvable:$true] %s106_s23 }
  0x12   : > { %p1600_p13 = scmp.ne.s32.totalorder %s2169_s1, %s1599_s27  ;;  %p1606_p3 = scmp.lt.u32.totalorder %s1599_s27, %s2169_s1 }
  0x13   : > { %p1777_p12 = pnand %p2171_p9, %p1541_p11 }
  0x15   : > { %p1601_p0 = pneg %p1777_p12 }
  0x17   : > { %p1602_p1 = pnand %p1601_p0, %p1600_p13 }
  0x19   : > { %p1603_p2 = pneg %p1602_p1 }
  0x1b   : > { %p1608_p4 = pnand %p1606_p3, %p1603_p2 }
  0x1d   : > { %1611 = shalt.err (!%p1608_p4)
}
  0x1e   : > { %s1612_s4 = scalar_lea.vmem %s107_s23, 2048  ;;  %p1620_p9 = scmp.lt.s32.totalorder %s107_s23, %s107_s23 }
  0x1f   : > { %p1613_p7 = scmp.ne.s32.totalorder %s107_s23, %s1612_s4  ;;  %p1621_p6 = scmp.lt.s32.totalorder %s1612_s4, %s1612_s4 }
  0x21   : > { %p1615_p8 = pnand %p1613_p7, %p1601_p0  ;;  %p1622_p5 = por %p1621_p6, %p1620_p9 }
  0x23   : > { %p1616_p11 = pneg %p1615_p8 }
  0x25   : > { %p1623_p10 = pnand %p1622_p5, %p1616_p11 }
  0x27   : > { %1626 = shalt.err (!%p1623_p10)
}
  0x28   : > { %s1696_s5 = smov 128   ;;  %s1697_s6 = smov 8  }
  0x29   : > { %1544 = dma.hbm_to_vmem [thread:$0]  (!%p1777_p12), %s2169_s1, 2048, %s107_s23, [#allocation3], %s1696_s5, %s1696_s5, %s1697_s6  }
  0x2a   : > { %p2178_p13 = scmp.ne.s32.totalorder %s2176_s21, 0 }
  0x2b   : > { %p2179_p1 = scmp.eq.s32.totalorder (!%p2178_p13), %s1741_s13, 0 }
  0x2c   : > { %131 = sbr.rel (%p2178_p13) target bundleno = 506 (0x1fa), region = 28 }
  0x33   : > { %1672 = dma.done.wait (%p2179_p1), [#allocation3], 2048   ;;  %p2180_p0 = pmov %p2179_p1 }
  0x34   : > { %s1001_s14 = sshll.u32 %s1741_s13, 1  ;;  %v1698_v0 = vmov 0   ;;  %v204_v3 = vld [vmem:[#allocation2] sm:$0xff]  ;;  %v205_v4 = vld [vmem:[#allocation2 + $0x8] sm:$0xff]  ;;  %v206_v6 = vld [vmem:[#allocation2 + $0x10] sm:$0xff]  ;;  %v1699_v14 = vmov 1  }
  0x35   : > { %1674 = vsyncadd (%p2180_p0), [#allocation3], 4294965248  ;;  %1595 = vset.pattern.permute.xlu1 %v1698_v0  ;;  %1593 = vset.pattern.permute.xlu0 %v1698_v0  ;;  %p154_p5 = scmp.lt.s32.totalorder %s1001_s14, 3  ;;  %v221_v5 = vand.u32 4294901760, %v204_v3  ;;  %v1807_v7 = vld [vmem:[#allocation2 + $0x18] sm:$0xff]  ;;  %v224_v8 = vand.u32 4294901760, %v205_v4 }
  0x36   : > { %v227_v9 = vand.u32 4294901760, %v206_v6  ;;  %v230_v10 = vand.u32 4294901760, %v1807_v7  ;;  %v1810_v11 = vld [vmem:[#allocation2 + $0x20] sm:$0xff]  ;;  %v1812_v12 = vld [vmem:[#allocation2 + $0x28] sm:$0xff]  ;;  %v1820_v18 = vld [vmem:[#allocation2 + $0x30] sm:$0xff]  ;;  %v1700_v23 = vmov 2  }
  0x37   : > { %s2188_s14 = smov (!%p154_p5, %s1001_s14), 3  ;;  %v1814_v13 = vpack.c.bf16 %v224_v8, %v221_v5  ;;  %v233_v16 = vand.u32 4294901760, %v1810_v11  ;;  %v236_v17 = vand.u32 4294901760, %v1812_v12  ;;  %v1822_v19 = vld [vmem:[#allocation2 + $0x38] sm:$0xff]  ;;  %v239_v21 = vand.u32 4294901760, %v1820_v18  ;;  %v1838_v24 = vld [vmem:[#allocation2 + $0x40] sm:$0xff] }
  0x38   : > { %s1002_s16 = sshll.u32 %s2188_s14, 3  ;;  %v1816_v15 = vpack.c.bf16 %v230_v10, %v227_v9  ;;  %v242_v22 = vand.u32 4294901760, %v1822_v19  ;;  %v1840_v25 = vld [vmem:[#allocation2 + $0x48] sm:$0xff]  ;;  %v245_v27 = vand.u32 4294901760, %v1838_v24  ;;  %v1854_v29 = vld [vmem:[#allocation2 + $0x50] sm:$0xff]  ;;  %v1856_v30 = vld [vmem:[#allocation2 + $0x58] sm:$0xff]  ;;  %v1858_v31 = vsub.f32 %v204_v3, %v221_v5 }
  0x39   : > { %s157_s23 = scalar_lea.vmem %s2168_s0, %s1002_s16  ;;  %1430 = vmatprep.subr.bf16.mxu0 %v1814_v13  ;;  %1334 = vmatprep.subr.bf16.mxu1 %v1814_v13  ;;  %v1834_v20 = vpack.c.bf16 %v236_v17, %v233_v16  ;;  %v248_v28 = vand.u32 4294901760, %v1840_v25  ;;  %v1860_v32 = vsub.f32 %v205_v4, %v224_v8  ;;  %v251_v34 = vand.u32 4294901760, %v1854_v29  ;;  %v1874_v36 = vld [vmem:[#allocation2 + $0x60] sm:$0xff]  ;;  %v1876_v37 = vld [vmem:[#allocation2 + $0x68] sm:$0xff]  ;;  %v1878_v38 = vld [vmem:[#allocation2 + $0x70] sm:$0xff]  ;;  %s150_s21 = sand.u32 1, %s1685_s10  }
  0x3a   : > { %v163_v1 = vld [vmem:[%s157_s23 + $0x8] sm:$0xff]  ;;  %v162_v2 = vld [vmem:[%s157_s23] sm:$0xff]  ;;  %1432 = vmatpush3.bf16.msra.mxu0 %v1814_v13  ;;  %1336 = vmatpush3.bf16.msra.mxu1 %v1814_v13  ;;  %v1850_v26 = vpack.c.bf16 %v242_v22, %v239_v21  ;;  %v254_v35 = vand.u32 4294901760, %v1856_v30  ;;  %v1880_v39 = vld [vmem:[#allocation2 + $0x78] sm:$0xff]  ;;  %v324_v40 = vand.u32 4294901760, %v1858_v31  ;;  %v257_v42 = vand.u32 4294901760, %v1874_v36 }
  0x3b   : > { %168 = vperm.xlu1 %1595, %v163_v1   ;;  %165 = vperm.xlu0 %1593, %v162_v2   ;;  %v1870_v33 = vpack.c.bf16 %v248_v28, %v245_v27  ;;  %v331_v41 = vand.u32 4294901760, %v1860_v32  ;;  %v260_v43 = vand.u32 4294901760, %v1876_v37  ;;  %v1888_v44 = vsub.f32 %v206_v6, %v227_v9  ;;  %s1000_s24 = sshll.u32 %s150_s21, 4  ;;  %s1014_s27 = sshll.u32 %s1741_s13, 8 }
  0x3c   : > { %1434 = vmatprep.subr.bf16.mxu0 %v1816_v15  ;;  %1338 = vmatprep.subr.bf16.mxu1 %v1816_v15  ;;  %v1896_v45 = vpack.c.bf16 %v254_v35, %v251_v34  ;;  %v1899_v46 = vsub.f32 %v1807_v7, %v230_v10  ;;  %v263_v47 = vand.u32 4294901760, %v1878_v38  ;;  %v266_v48 = vand.u32 4294901760, %v1880_v39  ;;  %s152_s25 = scalar_lea.vmem [#allocation5], %s1000_s24  ;;  %s2125_s30 = scalar_lea.hbm %s2170_s2, %s1014_s27 }
  0x3d   : > { %v338_v49 = vand.u32 4294901760, %v1888_v44  ;;  %v325_v50 = vsub.f32 %v1858_v31, %v324_v40  ;;  %v332_v51 = vsub.f32 %v1860_v32, %v331_v41  ;;  %v1913_v53 = vpack.c.bf16 %v260_v43, %v257_v42  ;;  %s920_s26 = sshll.u32 %s152_s25, 4  ;;  %s2127_s3 = scalar_lea.sflag [#allocation4], %s150_s21  ;;  %s2120_s26 = int_to_ptr.vmem [resolvable:$true] %s920_s26 }
  0x3e   : > { %1436 = vmatpush3.bf16.msra.mxu0 %v1816_v15  ;;  %1340 = vmatpush3.bf16.msra.mxu1 %v1816_v15  ;;  %v345_v52 = vand.u32 4294901760, %v1899_v46  ;;  %v1919_v55 = vsub.f32 %v1810_v11, %v233_v16  ;;  %v1929_v58 = vsub.f32 %v1812_v12, %v236_v17  ;;  %v1935_v59 = vpack.c.bf16 %v266_v48, %v263_v47  ;;  %s1627_s4 = scalar_lea.vmem %s2120_s26, 256  ;;  %p2181_p9 = scmp.ne.s32.totalorder %s2174_s19, 0 }
  0x3f   : > { %1596 = vset.pattern.permute.xlu1 %v1699_v14  ;;  %1594 = vset.pattern.permute.xlu0 %v1699_v14  ;;  %v339_v54 = vsub.f32 %v1888_v44, %v338_v49  ;;  %v326_v62 = vand.u32 4294901760, %v325_v50  ;;  %v333_v63 = vand.u32 4294901760, %v332_v51  ;;  %v1945_v3 = vsub.f32 %v1820_v18, %v239_v21  ;;  %p1628_p6 = scmp.ne.s32.totalorder %s2120_s26, %s1627_s4  ;;  %s1702_s13 = smov [#allocation5]  }
  0x40   : > { %180 = vperm.xlu1 %1596, %v163_v1   ;;  %177 = vperm.xlu0 %1594, %v162_v2   ;;  %v1923_v56 = vpack.c.bf16 %v345_v52, %v338_v49  ;;  %v346_v57 = vsub.f32 %v1899_v46, %v345_v52  ;;  %v352_v61 = vand.u32 4294901760, %v1919_v55  ;;  %v1950_v4 = vsub.f32 %v1822_v19, %v242_v22  ;;  %s1631_s5 = sshll.u32 %s1702_s13, 4  ;;  %s1632_s5 = int_to_ptr.vmem [resolvable:$false] %s1631_s5 }
  0x41   : > { %1438 = vmatprep.subr.bf16.mxu0 %v1834_v20  ;;  %1342 = vmatprep.subr.bf16.mxu1 %v1834_v20  ;;  %v340_v60 = vand.u32 4294901760, %v339_v54  ;;  %v366_v9 = vand.u32 4294901760, %v1945_v3  ;;  %v1961_v11 = vpack.c.bf16 %v331_v41, %v324_v40  ;;  %v1963_v12 = vpack.c.bf16 %v333_v63, %v326_v62  ;;  %p1629_p10 = pnand %p1628_p6, %p2181_p9  ;;  %s1633_s6 = scalar_lea.vmem %s1632_s5, 512 }
  0x42   : > { %1440 = vmatpush3.bf16.msra.mxu0 %v1834_v20  ;;  %1344 = vmatpush3.bf16.msra.mxu1 %v1834_v20  ;;  %v347_v0 = vand.u32 4294901760, %v346_v57  ;;  %v373_v10 = vand.u32 4294901760, %v1950_v4  ;;  %v379_v21 = vsub.f32 %v1838_v24, %v245_v27  ;;  %v386_v22 = vsub.f32 %v1840_v25, %v248_v28  ;;  %p1634_p2 = scmp.lt.s32.totalorder %s2120_s26, %s1632_s5  ;;  %p1635_p3 = scmp.lt.s32.totalorder %s1633_s6, %s1627_s4 }
  0x43   : > { %1442 = vmatprep.subr.bf16.mxu0 %v1850_v26  ;;  %1346 = vmatprep.subr.bf16.mxu1 %v1850_v26  ;;  %v367_v17 = vsub.f32 %v1945_v3, %v366_v9  ;;  %v393_v51 = vsub.f32 %v1854_v29, %v251_v34  ;;  %v400_v24 = vsub.f32 %v1856_v30, %v254_v35  ;;  %p1630_p12 = pneg %p1629_p10 }
  0x44   : > { %1597 = vset.pattern.permute.xlu1 %v1700_v23  ;;  %1598 = vset.pattern.permute.xlu0 %v1700_v23  ;;  %v1954_v5 = vpack.c.bf16 %v347_v0, %v340_v60  ;;  %v1967_v16 = vpack.c.bf16 %v373_v10, %v366_v9  ;;  %v374_v18 = vsub.f32 %v1950_v4, %v373_v10  ;;  %v380_v41 = vand.u32 4294901760, %v379_v21  ;;  %p1636_p4 = por %p1635_p3, %p1634_p2 }
  0x45   : > { %191 = vperm.xlu1 %1597, %v162_v2   ;;  %194 = vperm.xlu0 %1598, %v163_v1   ;;  %v359_v1 = vand.u32 4294901760, %v1929_v58  ;;  %v353_v2 = vsub.f32 %v1919_v55, %v352_v61  ;;  %v368_v23 = vand.u32 4294901760, %v367_v17  ;;  %v387_v49 = vand.u32 4294901760, %v386_v22 }
  0x46   : > { %1444 = vmatpush3.bf16.msra.mxu0 %v1850_v26  ;;  %1348 = vmatpush3.bf16.msra.mxu1 %v1850_v26  ;;  %v375_v40 = vand.u32 4294901760, %v374_v18  ;;  %v381_v27 = vsub.f32 %v379_v21, %v380_v41  ;;  %v394_v52 = vand.u32 4294901760, %v393_v51  ;;  %v401_v54 = vand.u32 4294901760, %v400_v24  ;;  %p1637_p7 = pnand %p1636_p4, %p1630_p12 }
  0x47   : > { %1446 = vmatprep.subr.bf16.mxu0 %v1870_v33  ;;  %1350 = vmatprep.subr.bf16.mxu1 %v1870_v33  ;;  %v1956_v6 = vpack.c.bf16 %v359_v1, %v352_v61  ;;  %v360_v7 = vsub.f32 %v1929_v58, %v359_v1  ;;  %v354_v8 = vand.u32 4294901760, %v353_v2  ;;  %v1993_v25 = vpack.c.bf16 %v387_v49, %v380_v41 }
  0x48   : > { %v1983_v50 = vpack.c.bf16 %v375_v40, %v368_v23  ;;  %v388_v28 = vsub.f32 %v386_v22, %v387_v49  ;;  %v382_v57 = vand.u32 4294901760, %v381_v27  ;;  %v1995_v61 = vpack.c.bf16 %v401_v54, %v394_v52 }
  0x49   : > { %v361_v14 = vand.u32 4294901760, %v360_v7  ;;  %v395_v62 = vsub.f32 %v393_v51, %v394_v52  ;;  %v402_v29 = vsub.f32 %v400_v24, %v401_v54  ;;  %v407_v30 = vsub.f32 %v1874_v36, %v257_v42 }
  0x4a   : > { %1448 = vmatpush3.bf16.msra.mxu0 %v1870_v33  ;;  %1352 = vmatpush3.bf16.msra.mxu1 %v1870_v33  ;;  %v389_v60 = vand.u32 4294901760, %v388_v28  ;;  %v414_v35 = vsub.f32 %v1876_v37, %v260_v43  ;;  %v421_v9 = vsub.f32 %v1878_v38, %v263_v47  ;;  %v428_v36 = vsub.f32 %v1880_v39, %v266_v48 }
  0x4b   : > { %1450 = vmatprep.subr.bf16.mxu0 %v1896_v45  ;;  %1354 = vmatprep.subr.bf16.mxu1 %v1896_v45  ;;  %v1973_v19 = vpack.c.bf16 %v361_v14, %v354_v8  ;;  %v396_v63 = vand.u32 4294901760, %v395_v62  ;;  %v403_v0 = vand.u32 4294901760, %v402_v29  ;;  %v408_v1 = vand.u32 4294901760, %v407_v30 }
  0x4c   : > { %v2000_v34 = vpack.c.bf16 %v389_v60, %v382_v57  ;;  %v415_v2 = vand.u32 4294901760, %v414_v35  ;;  %v422_v37 = vand.u32 4294901760, %v421_v9  ;;  %v429_v43 = vand.u32 4294901760, %v428_v36 }
  0x4d   : > { %v2005_v7 = vpack.c.bf16 %v403_v0, %v396_v63  ;;  %v409_v8 = vsub.f32 %v407_v30, %v408_v1  ;;  %v2023_v39 = vpack.c.bf16 %v1860_v32, %v1858_v31  ;;  %v2027_v47 = vpack.c.bf16 %v1899_v46, %v1888_v44 }
  0x4e   : > { %1452 = vmatpush3.bf16.msra.mxu0 %v1896_v45  ;;  %1356 = vmatpush3.bf16.msra.mxu1 %v1896_v45  ;;  %v2013_v42 = vpack.c.bf16 %v415_v2, %v408_v1  ;;  %v416_v10 = vsub.f32 %v414_v35, %v415_v2  ;;  %v2015_v18 = vpack.c.bf16 %v429_v43, %v422_v37  ;;  %v160_v32 = vlaneseq }
  0x4f   : > { %1454 = vmatprep.subr.bf16.mxu0 %v1913_v53  ;;  %1358 = vmatprep.subr.bf16.mxu1 %v1913_v53  ;;  %v410_v14 = vand.u32 4294901760, %v409_v8  ;;  %v423_v23 = vsub.f32 %v421_v9, %v422_v37  ;;  %v430_v40 = vsub.f32 %v428_v36, %v429_v43  ;;  %v2031_v48 = vpack.c.bf16 %v1929_v58, %v1919_v55 }
  0x50   : > { %v417_v17 = vand.u32 4294901760, %v416_v10  ;;  %v2035_v28 = vpack.c.bf16 %v1950_v4, %v1945_v3  ;;  %v2037_v52 = vpack.c.bf16 %v386_v22, %v379_v21  ;;  %v2039_v54 = vpack.c.bf16 %v400_v24, %v393_v51 }
  0x51   : > { %v424_v49 = vand.u32 4294901760, %v423_v23  ;;  %v431_v27 = vand.u32 4294901760, %v430_v40  ;;  %v2041_v57 = vpack.c.bf16 %v414_v35, %v407_v30  ;;  %v2043_v31 = vpack.c.bf16 %v428_v36, %v421_v9 }
  0x52   : > { %1456 = vmatpush3.bf16.msra.mxu0 %v1913_v53  ;;  %1360 = vmatpush3.bf16.msra.mxu1 %v1913_v53  ;;  %v2017_v41 = vpack.c.bf16 %v417_v17, %v410_v14  ;;  %v161_v46 = vand.u32 127, %v160_v32  ;;  %v1701_v55 = vmov 0.0  }
  0x53   : > { %1458 = vmatprep.subr.bf16.mxu0 %v1935_v59  ;;  %1362 = vmatprep.subr.bf16.mxu1 %v1935_v59  ;;  %v2019_v38 = vpack.c.bf16 %v431_v27, %v424_v49 }
  0x56   : > { %1460 = vmatpush3.bf16.msra.mxu0 %v1935_v59  ;;  %1364 = vmatpush3.bf16.msra.mxu1 %v1935_v59 }
  0x57   : > { %1462 = vmatprep.subr.bf16.mxu0 %v1961_v11  ;;  %1366 = vmatprep.subr.bf16.mxu1 %v1963_v12 }
  0xba   : > { %v169_v60 = vpop.permute.xlu1 %168  ;;  %v166_v44 = vpop.permute.xlu0 %165 }
  0xbb   : > { %vm171_vm2 = vcmp.eq.s32.totalorder %v169_v60, %v161_v46  ;;  %vm170_vm3 = vcmp.eq.s32.totalorder %v166_v44, %v161_v46 }
  0xbc   : > { %v1004_v4 = vsel %vm171_vm2, 1.0, %v1701_v55  ;;  %v1003_v21 = vsel %vm170_vm3, 1.0, %v1701_v55 }
  0xbf   : > { %v181_v62 = vpop.permute.xlu1 %180  ;;  %v178_v29 = vpop.permute.xlu0 %177 }
  0xc0   : > { %vm183_vm0 = vcmp.eq.s32.totalorder %v181_v62, %v161_v46  ;;  %vm182_vm1 = vcmp.eq.s32.totalorder %v178_v29, %v161_v46 }
  0xc1   : > { %v1006_v58 = vsel %vm183_vm0, 1.0, %v1701_v55  ;;  %v1005_v3 = vsel %vm182_vm1, 1.0, %v1701_v55 }
  0xc2   : > { %v189_v24 = vadd.f32 %v1006_v58, %v1004_v4  ;;  %v188_v30 = vadd.f32 %v1005_v3, %v1003_v21 }
  0xc4   : > { %v192_v22 = vpop.permute.xlu1 %191  ;;  %v195_v51 = vpop.permute.xlu0 %194 }
  0xc5   : > { %vm196_vm4 = vcmp.eq.s32.totalorder %v192_v22, %v161_v46  ;;  %vm197_vm5 = vcmp.eq.s32.totalorder %v195_v51, %v161_v46 }
  0xc6   : > { %v1007_v35 = vsel %vm196_vm4, 1.0, %v1701_v55  ;;  %v1008_v63 = vsel %vm197_vm5, 1.0, %v1701_v55 }
  0xc7   : > { %v202_v0 = vadd.f32 %v1007_v35, %v188_v30  ;;  %v203_v1 = vadd.f32 %v1008_v63, %v189_v24 }
  0xc9   : > { %v301_v2 = vand.u32 4294901760, %v202_v0  ;;  %v2045_v8 = vand.u32 4294901760, %v203_v1 }
  0xcb   : > { %v302_v9 = vsub.f32 %v202_v0, %v301_v2  ;;  %v2048_v36 = vsub.f32 %v203_v1, %v2045_v8 }
  0xcd   : > { %v303_v10 = vand.u32 4294901760, %v302_v9  ;;  %v313_v14 = vand.u32 4294901760, %v2048_v36 }
  0xcf   : > { %1260 = vmatprep.mubr.f32.mxu0 %v303_v10  ;;  %v304_v37 = vsub.f32 %v302_v9, %v303_v10  ;;  %v314_v43 = vsub.f32 %v2048_v36, %v313_v14 }
  0xd0   : > { %1261 = vmatmul.mubr.f32.vlgmr.msra.gmra.mrb[0].mxu0 %v313_v14 }
  0xd1   : > { %1464 = vmatpush3.bf16.msra.mxu0 %v1961_v11  ;;  %1295 = vmatprep.mubr.f32.mxu0 %v301_v2  ;;  %v305_v17 = vand.u32 4294901760, %v304_v37  ;;  %v315_v23 = vand.u32 4294901760, %v314_v43 }
  0xd2   : > { %1466 = vmatprep.subr.bf16.mxu0 %v1923_v56 }
  0xd3   : > { %1155 = vmatprep.mubr.f32.mxu1 %v305_v17 }
  0xd4   : > { %1156 = vmatmul.mubr.f32.vlgmr.msra.gmra.mrb[0].mxu1 %v315_v23 }
  0xd5   : > { %1368 = vmatpush3.bf16.msra.mxu1 %v1963_v12  ;;  %1468 = vmatpush3.bf16.msra.mxu0 %v1923_v56 }
  0xd6   : > { %1190 = vmatprep.mubr.f32.mxu1 %v301_v2  ;;  %1370 = vmatprep.subr.bf16.mxu1 %v1954_v5 }
  0xd7   : > { %1470 = vmatprep.subr.bf16.mxu0 %v1956_v6 }
  0xd9   : > { %1372 = vmatpush3.bf16.msra.mxu1 %v1954_v5  ;;  %1472 = vmatpush3.bf16.msra.mxu0 %v1956_v6 }
  0xda   : > { %1374 = vmatprep.subr.bf16.mxu1 %v1973_v19  ;;  %1474 = vmatprep.subr.bf16.mxu0 %v1967_v16 }
  0xdd   : > { %1376 = vmatpush3.bf16.msra.mxu1 %v1973_v19  ;;  %1476 = vmatpush3.bf16.msra.mxu0 %v1967_v16 }
  0xde   : > { %1378 = vmatprep.subr.bf16.mxu1 %v1983_v50  ;;  %1478 = vmatprep.subr.bf16.mxu0 %v1993_v25 }
  0xe1   : > { %1380 = vmatpush3.bf16.msra.mxu1 %v1983_v50  ;;  %1480 = vmatpush3.bf16.msra.mxu0 %v1993_v25 }
  0xe2   : > { %1382 = vmatprep.subr.bf16.mxu1 %v2000_v34  ;;  %1482 = vmatprep.subr.bf16.mxu0 %v1995_v61 }
  0xe5   : > { %1384 = vmatpush3.bf16.msra.mxu1 %v2000_v34  ;;  %1484 = vmatpush3.bf16.msra.mxu0 %v1995_v61 }
  0xe6   : > { %1386 = vmatprep.subr.bf16.mxu1 %v2005_v7  ;;  %1486 = vmatprep.subr.bf16.mxu0 %v2013_v42 }
  0xe9   : > { %1388 = vmatpush3.bf16.msra.mxu1 %v2005_v7  ;;  %1488 = vmatpush3.bf16.msra.mxu0 %v2013_v42 }
  0xea   : > { %1390 = vmatprep.subr.bf16.mxu1 %v2017_v41  ;;  %1490 = vmatprep.subr.bf16.mxu0 %v2015_v18 }
  0xed   : > { %1392 = vmatpush3.bf16.msra.mxu1 %v2017_v41  ;;  %1492 = vmatpush3.bf16.msra.mxu0 %v2015_v18 }
  0xee   : > { %1394 = vmatprep.subr.bf16.mxu1 %v2019_v38  ;;  %1494 = vmatprep.subr.bf16.mxu0 %v1814_v13 }
  0xf0   : > { %1296 = vmatmul.mubr.f32.vlgmr.msra.gmra.mrb[0].mxu0 %v2045_v8 }
  0xf1   : > { %1396 = vmatpush3.bf16.msra.mxu1 %v2019_v38  ;;  %1496 = vmatpush3.bf16.msra.mxu0 %v1814_v13 }
  0xf2   : > { %1330 = vmatprep.mubr.f32.mxu0 %v301_v2  ;;  %1398 = vmatprep.subr.bf16.mxu1 %v2023_v39 }
  0xf3   : > { %1498 = vmatprep.subr.bf16.mxu0 %v1816_v15 }
  0xf4   : > { %1191 = vmatmul.mubr.f32.vlgmr.msra.gmra.mrb[0].mxu1 %v2045_v8 }
  0xf5   : > { %1400 = vmatpush3.bf16.msra.mxu1 %v2023_v39  ;;  %1225 = vmatprep.mubr.f32.mxu1 %v302_v9 }
  0xf6   : > { %1500 = vmatpush3.bf16.msra.mxu0 %v1816_v15  ;;  %1402 = vmatprep.subr.bf16.mxu1 %v2027_v47 }
  0xf7   : > { %1502 = vmatprep.subr.bf16.mxu0 %v1834_v20 }
  0xf9   : > { %1404 = vmatpush3.bf16.msra.mxu1 %v2027_v47 }
  0xfa   : > { %1504 = vmatpush3.bf16.msra.mxu0 %v1834_v20  ;;  %1406 = vmatprep.subr.bf16.mxu1 %v2031_v48 }
  0xfb   : > { %1506 = vmatprep.subr.bf16.mxu0 %v1850_v26 }
  0xfd   : > { %1408 = vmatpush3.bf16.msra.mxu1 %v2031_v48 }
  0xfe   : > { %1508 = vmatpush3.bf16.msra.mxu0 %v1850_v26  ;;  %1410 = vmatprep.subr.bf16.mxu1 %v2035_v28 }
  0xff   : > { %1510 = vmatprep.subr.bf16.mxu0 %v1870_v33 }
 0x101   : > { %1412 = vmatpush3.bf16.msra.mxu1 %v2035_v28 }
 0x102   : > { %1512 = vmatpush3.bf16.msra.mxu0 %v1870_v33  ;;  %1414 = vmatprep.subr.bf16.mxu1 %v2037_v52 }
 0x103   : > { %1514 = vmatprep.subr.bf16.mxu0 %v1896_v45 }
 0x105   : > { %1416 = vmatpush3.bf16.msra.mxu1 %v2037_v52 }
 0x106   : > { %1516 = vmatpush3.bf16.msra.mxu0 %v1896_v45  ;;  %1418 = vmatprep.subr.bf16.mxu1 %v2039_v54 }
 0x107   : > { %1518 = vmatprep.subr.bf16.mxu0 %v1913_v53 }
 0x109   : > { %1420 = vmatpush3.bf16.msra.mxu1 %v2039_v54 }
 0x10a   : > { %1520 = vmatpush3.bf16.msra.mxu0 %v1913_v53  ;;  %1422 = vmatprep.subr.bf16.mxu1 %v2041_v57 }
 0x10b   : > { %1522 = vmatprep.subr.bf16.mxu0 %v1935_v59 }
 0x10d   : > { %1424 = vmatpush3.bf16.msra.mxu1 %v2041_v57 }
 0x10e   : > { %1524 = vmatpush3.bf16.msra.mxu0 %v1935_v59  ;;  %1426 = vmatprep.subr.bf16.mxu1 %v2043_v31 }
 0x111   : > { %1331 = vmatmul.mubr.f32.vlgmr.msra.gmra.mrb[0].mxu0 %v2045_v8  ;;  %1428 = vmatpush3.bf16.msra.mxu1 %v2043_v31 }
 0x114   : > { %1226 = vmatmul.mubr.f32.vlgmr.msra.gmra.mrb[0].mxu1 %v2048_v36 }
 0x1e4   : > { %v1332_v13 = vpop.f32.mrb[0].mxu0 }
 0x1e5   : > { %v894_v15 = vpop.f32.mrb[1].mxu0 }
 0x1e7   : > { %v1227_v20 = vpop.f32.mrb[0].mxu1 }
 0x1e8   : > { %v1525_v26 = vadd.f32 %v1332_v13, %v1227_v20  ;;  %v578_v33 = vpop.f32.mrb[1].mxu1 }
 0x1e9   : > { %v1526_v45 = vadd.f32 %v894_v15, %v578_v33 }
 0x1ea   : > { %905 = vst [vmem:[%s152_s25 + $0x8] sm:$0xff] %v1525_v26 }
 0x1eb   : > { %904 = vst [vmem:[%s152_s25] sm:$0xff] %v1526_v45 }
 0x1ec   : > { %1640 = shalt.err (!%p1637_p7)
}
 0x1ed   : > { %s1641_s7 = scalar_lea.hbm %s2125_s30, 256  ;;  %s1645_s16 = scalar_lea.hbm %s2170_s2, 512 }
 0x1ee   : > { %p1642_p8 = scmp.ne.s32.totalorder %s2125_s30, %s1641_s7  ;;  %p1646_p1 = scmp.lt.u32.totalorder %s2125_s30, %s2170_s2 }
 0x1ef   : > { %p1647_p0 = scmp.lt.u32.totalorder %s1645_s16, %s1641_s7  ;;  %p1649_p6 = scmp.lt.u32.totalorder %s1641_s7, %s2125_s30 }
 0x1f0   : > { %p1643_p11 = pnand %p1642_p8, %p2181_p9 }
 0x1f1   : > { %p1648_p5 = por %p1647_p0, %p1646_p1 }
 0x1f2   : > { %p1644_p13 = pneg %p1643_p11 }
 0x1f3   : > { %p1650_p10 = por %p1649_p6, %p1648_p5 }
 0x1f5   : > { %p1651_p12 = pnand %p1650_p10, %p1644_p13 }
 0x1f7   : > { %1654 = shalt.err (!%p1651_p12)
}
 0x1f8   : > { %s1703_s23 = smov 128   ;;  %s1704_s21 = smov 8  }
 0x1f9   : > { %1539 = dma.vmem_to_hbm [thread:$0]  (%p2181_p9), %s2120_s26, 256, %s2125_s30, %s2127_s3, %s1703_s23, %s1703_s23, %s1704_s21  }
 0x1fa PF: > { %p1551_p2 = scmp.ge.s32.totalorder %s1693_s12, 2  ;;  %s935_s24 = sand.u32 1, %s1681_s9  }
 0x1fb   : > { %p2182_p3 = scmp.ne.s32.totalorder %s2175_s20, 0  ;;  %s936_s25 = scalar_lea.sflag [#allocation4], %s935_s24 }
 0x1fd   : > { %p1546_p4 = pnand %p1551_p2, %p2182_p3 }
 0x1ff   : > { %1676 = dma.done.wait (!%p1546_p4), %s936_s25, 256  }
 0x200   : > { %1678 = vsyncadd (!%p1546_p4), %s936_s25, 4294967040  ;;  %p13_p7 = scmp.ge.s32.totalorder %s1745_s15, 4   ;;  %s2183_s9 = smov %s1685_s10 }
 0x201   : > { %s2184_s10 = smov %s1689_s11  ;;  %s2185_s11 = smov %s1756_s18 }
 0x202   : > { %s2186_s12 = smov %s1745_s15  ;;  %15 = sbr.rel (!%p13_p7) target bundleno = 4 (0x4), region = 68 }
 0x209   :  { %941 = vsyncpa [#allocation3], 1 }
 0x20a   :  { %943 = vsyncpa [#allocation3 + $0x1], 1 }
 0x20b   :  { %944 = vsyncpa [#allocation4], 1 }
 0x20c   :  { %946 = vsyncpa [#allocation4 + $0x1], 1 }

</bundles_post_ra>
